<compile_context>
chip_gen: v5e
topology: v5e:2x2
jax: 0.10.0
libtpu: 0.0.40
codegen_flags: <defaults>
</compile_context>

<pallas_src>
import functools

import jax
import jax.numpy as jnp
from jax.experimental import pallas as pl
from jax.experimental.pallas import tpu as pltpu


_N_BISECT = 30  # f32 bisection on [-1, 0] converges to ~ulp well before 30.


def _sparsemax_loss_kernel(x_ref, tgt_ref, wk_ref, out_ref):
    x = x_ref[...].astype(jnp.float32)        # (TB, C)
    tgt = tgt_ref[...]                        # (TB, 1) int32
    w_k = wk_ref[...].astype(jnp.float32)     # (TB, 1)
    TB, C = x.shape

    # z_k = x[b, target[b]] via a one-hot select (single cross-lane reduce).
    col = jax.lax.broadcasted_iota(jnp.int32, (TB, C), 1)
    z_k = jnp.sum(jnp.where(col == tgt, x, 0.0), axis=-1, keepdims=True)

    # Shift by the row max (matches the reference exactly); now max(z) == 0.
    z = x - jnp.max(x, axis=-1, keepdims=True)                  # (TB, C)

    # ---- sparsemax threshold tau -------------------------------------------
    # tau is the unique root of g(tau) = sum_j relu(z_j - tau) - 1, and it
    # lies in [max(z) - 1, max(z)) = [-1, 0).  Fixed-count bisection is pure
    # VPU work + one lane reduction per iteration (vs. 2*C reductions before).
    def bisect_body(_, carry):
        lo, hi = carry                                          # (TB, 1) each
        mid = 0.5 * (lo + hi)
        g = jnp.sum(jnp.maximum(z - mid, 0.0), axis=-1, keepdims=True) - 1.0
        above = g > 0.0                                         # root > mid
        return jnp.where(above, mid, lo), jnp.where(above, hi, mid)

    lo0 = jnp.full((TB, 1), -1.0, dtype=jnp.float32)
    hi0 = jnp.zeros((TB, 1), dtype=jnp.float32)
    lo, hi = jax.lax.fori_loop(0, _N_BISECT, bisect_body, (lo0, hi0))
    mid = 0.5 * (lo + hi)

    # Exact finalisation: recover the support from the (ulp-tight) bracket
    # and apply the same closed form as the sorted reference:
    #   tau = (sum_{j in S} z_j - 1) / |S|,   S = {j : z_j > tau}.
    sup = z > mid                                               # (TB, C) bool
    k = jnp.sum(sup.astype(jnp.float32), axis=-1, keepdims=True)  # |S| >= 1
    s = jnp.sum(jnp.where(sup, z, 0.0), axis=-1, keepdims=True)
    taus = (s - 1.0) / k                                        # (TB, 1)

    # ---- loss ---------------------------------------------------------------
    z2_t2 = z * z - taus * taus
    z_t2 = jnp.sum(jnp.maximum(z2_t2, 0.0), axis=-1, keepdims=True)
    loss = (0.5 * (z_t2 + 1.0) - z_k) * w_k                     # (TB, 1)
    out_ref[...] = loss.astype(out_ref.dtype)


def _round_up(x, m):
    return (x + m - 1) // m * m


def _cdiv(a, b):
    return -(-a // b)


@functools.partial(jax.jit, static_argnames=("reduction", "block_b"))
def single_label_sparsemax(x, target, weight=None, *, reduction="mean",
                           block_b=None):
    """x: (B, C) float, target: (B,) int, weight: (C,) float or None."""
    if reduction not in ("mean", "sum", "none"):
        raise ValueError(f"reduction is {reduction} not in [mean, sum, none]")
    B, C = x.shape

    x = x.astype(jnp.float32)          # keep compute in f32 (v5e: no bf16 VPU)
    target = target.astype(jnp.int32)
    if weight is None:
        w_k = jnp.ones((B,), dtype=jnp.float32)
    else:
        w_k = weight.astype(jnp.float32)[target]   # trivial gather, XLA fuses

    # ---- batch-tile selection ----------------------------------------------
    rows8 = _round_up(B, 8)
    if block_b is None:
        # ~2 MiB of x per tile; double-buffered input + (TB,C) temporaries
        # stay well under the 32 MiB scoped-VMEM limit set below.
        # TODO(synk): on v7x (64 MiB total VMEM) this is already conservative;
        # a per-chip budget via pltpu.get_tpu_info() could push it higher.
        cap = (2 * 1024 * 1024) // (4 * C)
        cap = max(8, min(512, (cap // 8) * 8))
    else:
        cap = max(8, _round_up(block_b, 8))
    n_blocks = max(1, _cdiv(rows8, cap))
    if rows8 >= 16:
        n_blocks = max(n_blocks, 2)    # >=2 grid steps -> both v7x TensorCores
    bb = _round_up(_cdiv(rows8, n_blocks), 8)
    padded_B = n_blocks * bb

    # ---- ragged-tail padding (padded rows get weight 0, sliced off below) ---
    pad = padded_B - B
    if pad:
        x = jnp.pad(x, ((0, pad), (0, 0)))
        target = jnp.pad(target, (0, pad))
        w_k = jnp.pad(w_k, (0, pad))

    tgt2d = target.reshape(padded_B, 1)
    wk2d = w_k.reshape(padded_B, 1)

    loss2d = pl.pallas_call(
        _sparsemax_loss_kernel,
        out_shape=jax.ShapeDtypeStruct((padded_B, 1), jnp.float32),
        grid_spec=pltpu.PrefetchScalarGridSpec(
            num_scalar_prefetch=0,
            grid=(n_blocks,),
            in_specs=[
                pl.BlockSpec((bb, C), lambda i: (i, 0)),   # input rows
                pl.BlockSpec((bb, 1), lambda i: (i, 0)),   # targets
                pl.BlockSpec((bb, 1), lambda i: (i, 0)),   # gathered weights
            ],
            out_specs=pl.BlockSpec((bb, 1), lambda i: (i, 0)),
        ),
        compiler_params=pltpu.CompilerParams(
            dimension_semantics=("parallel",),
            vmem_limit_bytes=32 * 1024 * 1024),
    )(x, tgt2d, wk2d)

    loss = loss2d[:B, 0]
    if reduction == "mean":
        return jnp.mean(loss)
    elif reduction == "sum":
        return jnp.sum(loss)
    return loss


def _reference_loss(x, target, weight=None, reduction="mean"):
    """Pure-JAX mirror of the PyTorch forward (sort-based), for verification."""
    B, C = x.shape
    z_k = x[jnp.arange(B), target]
    w_k = jnp.ones((B,), x.dtype) if weight is None else weight[target]
    z = x - jnp.max(x, axis=-1, keepdims=True)
    zs = -jnp.sort(-z, axis=-1)
    rng = jnp.arange(1, C + 1, dtype=x.dtype)[None, :]
    bound = 1.0 + rng * zs
    is_gt = (bound > jnp.cumsum(zs, axis=-1)).astype(x.dtype)
    k = jnp.max(is_gt * rng, axis=-1, keepdims=True)
    taus = (jnp.sum(is_gt * zs, axis=-1, keepdims=True) - 1.0) / k
    z_t2 = jnp.sum(jnp.maximum(0.0, z * z - taus * taus), axis=1)
    loss = (0.5 * (z_t2 + 1.0) - z_k) * w_k
    if reduction == "mean":
        return jnp.mean(loss)
    if reduction == "sum":
        return jnp.sum(loss)
    return loss


if __name__ == "__main__":
    key = jax.random.PRNGKey(0)
    kx, kt, kw, kx2, kt2 = jax.random.split(key, 5)

    # Case 1: weighted, batch multiple of 8.
    B, C = 8, 32
    x = jax.random.normal(kx, (B, C), dtype=jnp.float32)
    target = jax.random.randint(kt, (B,), 0, C, dtype=jnp.int32)
    weight = 0.5 + jax.random.uniform(kw, (C,), dtype=jnp.float32)

    out_mean = jax.block_until_ready(
        single_label_sparsemax(x, target, weight, reduction="mean"))
    out_none = jax.block_until_ready(
        single_label_sparsemax(x, target, weight, reduction="none"))
    assert jnp.allclose(out_mean, _reference_loss(x, target, weight, "mean"),
                        atol=1e-5, rtol=1e-5)
    assert jnp.allclose(out_none, _reference_loss(x, target, weight, "none"),
                        atol=1e-5, rtol=1e-5)

    # Case 2: unweighted, ragged batch (exercises padding + 2-step grid).
    B2 = 10
    x2 = jax.random.normal(kx2, (B2, C), dtype=jnp.float32)
    target2 = jax.random.randint(kt2, (B2,), 0, C, dtype=jnp.int32)
    out_sum = jax.block_until_ready(
        single_label_sparsemax(x2, target2, None, reduction="sum"))
    assert jnp.allclose(out_sum, _reference_loss(x2, target2, None, "sum"),
                        atol=1e-5, rtol=1e-5)

    print("KERNEL_OK")
</pallas_src>

<mosaic_0001>
module attributes {stable_mosaic.version = 11 : i64} {
  func.func @_sparsemax_loss_kernel(%arg0: i32, %arg1: memref<8x32xf32, #tpu.memory_space<vmem>>, %arg2: memref<8x1xi32, #tpu.memory_space<vmem>>, %arg3: memref<8x1xf32, #tpu.memory_space<vmem>>, %arg4: memref<8x1xf32, #tpu.memory_space<vmem>>) attributes {dimension_semantics = [#tpu.dimension_semantics<parallel>], iteration_bounds = array<i64: 1>, scalar_prefetch = 0 : i64, scratch_operands = 0 : i64, tpu.core_type = #tpu.core_type<tc>, window_params = [{transform_indices = @transform_0, window_bounds = array<i64: 8, 32>}, {transform_indices = @transform_1, window_bounds = array<i64: 8, 1>}, {transform_indices = @transform_2, window_bounds = array<i64: 8, 1>}, {transform_indices = @transform_3, window_bounds = array<i64: 8, 1>}]} {
    %c0 = arith.constant 0 : index
    %c0_0 = arith.constant 0 : index
    %0 = vector.load %arg1[%c0, %c0_0] : memref<8x32xf32, #tpu.memory_space<vmem>>, vector<8x32xf32>
    %c0_1 = arith.constant 0 : index
    %c0_2 = arith.constant 0 : index
    %1 = vector.load %arg2[%c0_1, %c0_2] : memref<8x1xi32, #tpu.memory_space<vmem>>, vector<8x1xi32>
    %c0_3 = arith.constant 0 : index
    %c0_4 = arith.constant 0 : index
    %2 = vector.load %arg3[%c0_3, %c0_4] : memref<8x1xf32, #tpu.memory_space<vmem>>, vector<8x1xf32>
    %3 = tpu.iota {dimensions = array<i32: 1>} : vector<8x32xi32>
    %4 = vector.broadcast %1 : vector<8x1xi32> to vector<8x32xi32>
    %5 = arith.cmpi eq, %3, %4 : vector<8x32xi32>
    %cst = arith.constant 0.000000e+00 : f32
    %6 = vector.broadcast %cst : f32 to vector<8x32xf32>
    %7 = arith.select %5, %0, %6 : vector<8x32xi1>, vector<8x32xf32>
    %cst_5 = arith.constant dense<0.000000e+00> : vector<8xf32>
    %8 = vector.multi_reduction <add>, %7, %cst_5 [1] : vector<8x32xf32> to vector<8xf32>
    %9 = vector.shape_cast %8 : vector<8xf32> to vector<8x1xf32>
    %cst_6 = arith.constant dense<0xFF800000> : vector<8xf32>
    %10 = vector.multi_reduction <maximumf>, %0, %cst_6 [1] : vector<8x32xf32> to vector<8xf32>
    %11 = vector.shape_cast %10 : vector<8xf32> to vector<8x1xf32>
    %12 = vector.broadcast %11 : vector<8x1xf32> to vector<8x32xf32>
    %13 = arith.subf %0, %12 : vector<8x32xf32>
    %cst_7 = arith.constant -1.000000e+00 : f32
    %14 = vector.broadcast %cst_7 : f32 to vector<8x1xf32>
    %cst_8 = arith.constant 0.000000e+00 : f32
    %15 = vector.broadcast %cst_8 : f32 to vector<8x1xf32>
    %c0_i32 = arith.constant 0 : i32
    %c30_i32 = arith.constant 30 : i32
    %16 = arith.addi %c0_i32, %c30_i32 : i32
    %c1_i32 = arith.constant 1 : i32
    %17:2 = scf.for %arg5 = %c0_i32 to %16 step %c1_i32 iter_args(%arg6 = %14, %arg7 = %15) -> (vector<8x1xf32>, vector<8x1xf32>)  : i32 {
      %49 = arith.addf %arg6, %arg7 : vector<8x1xf32>
      %cst_20 = arith.constant 5.000000e-01 : f32
      %50 = vector.broadcast %cst_20 : f32 to vector<8x1xf32>
      %51 = arith.mulf %50, %49 : vector<8x1xf32>
      %52 = vector.broadcast %51 : vector<8x1xf32> to vector<8x32xf32>
      %53 = arith.subf %13, %52 : vector<8x32xf32>
      %cst_21 = arith.constant 0.000000e+00 : f32
      %54 = vector.broadcast %cst_21 : f32 to vector<8x32xf32>
      %55 = arith.maximumf %53, %54 : vector<8x32xf32>
      %cst_22 = arith.constant dense<0.000000e+00> : vector<8xf32>
      %56 = vector.multi_reduction <add>, %55, %cst_22 [1] : vector<8x32xf32> to vector<8xf32>
      %57 = vector.shape_cast %56 : vector<8xf32> to vector<8x1xf32>
      %cst_23 = arith.constant 1.000000e+00 : f32
      %58 = vector.broadcast %cst_23 : f32 to vector<8x1xf32>
      %59 = arith.subf %57, %58 : vector<8x1xf32>
      %cst_24 = arith.constant 0.000000e+00 : f32
      %60 = vector.broadcast %cst_24 : f32 to vector<8x1xf32>
      %61 = arith.cmpf ogt, %59, %60 : vector<8x1xf32>
      %62 = arith.select %61, %51, %arg6 : vector<8x1xi1>, vector<8x1xf32>
      %63 = arith.select %61, %arg7, %51 : vector<8x1xi1>, vector<8x1xf32>
      scf.yield %62, %63 : vector<8x1xf32>, vector<8x1xf32>
    }
    %18 = arith.addf %17#0, %17#1 : vector<8x1xf32>
    %cst_9 = arith.constant 5.000000e-01 : f32
    %19 = vector.broadcast %cst_9 : f32 to vector<8x1xf32>
    %20 = arith.mulf %19, %18 : vector<8x1xf32>
    %21 = vector.broadcast %20 : vector<8x1xf32> to vector<8x32xf32>
    %22 = arith.cmpf ogt, %13, %21 : vector<8x32xf32>
    %23 = arith.extui %22 : vector<8x32xi1> to vector<8x32xi32>
    %24 = arith.sitofp %23 : vector<8x32xi32> to vector<8x32xf32>
    %cst_10 = arith.constant dense<0.000000e+00> : vector<8xf32>
    %25 = vector.multi_reduction <add>, %24, %cst_10 [1] : vector<8x32xf32> to vector<8xf32>
    %26 = vector.shape_cast %25 : vector<8xf32> to vector<8x1xf32>
    %cst_11 = arith.constant 0.000000e+00 : f32
    %27 = vector.broadcast %cst_11 : f32 to vector<8x32xf32>
    %28 = arith.select %22, %13, %27 : vector<8x32xi1>, vector<8x32xf32>
    %cst_12 = arith.constant dense<0.000000e+00> : vector<8xf32>
    %29 = vector.multi_reduction <add>, %28, %cst_12 [1] : vector<8x32xf32> to vector<8xf32>
    %30 = vector.shape_cast %29 : vector<8xf32> to vector<8x1xf32>
    %cst_13 = arith.constant 1.000000e+00 : f32
    %31 = vector.broadcast %cst_13 : f32 to vector<8x1xf32>
    %32 = arith.subf %30, %31 : vector<8x1xf32>
    %33 = arith.divf %32, %26 : vector<8x1xf32>
    %34 = arith.mulf %13, %13 : vector<8x32xf32>
    %35 = arith.mulf %33, %33 : vector<8x1xf32>
    %36 = vector.broadcast %35 : vector<8x1xf32> to vector<8x32xf32>
    %37 = arith.subf %34, %36 : vector<8x32xf32>
    %cst_14 = arith.constant 0.000000e+00 : f32
    %38 = vector.broadcast %cst_14 : f32 to vector<8x32xf32>
    %39 = arith.maximumf %37, %38 : vector<8x32xf32>
    %cst_15 = arith.constant dense<0.000000e+00> : vector<8xf32>
    %40 = vector.multi_reduction <add>, %39, %cst_15 [1] : vector<8x32xf32> to vector<8xf32>
    %41 = vector.shape_cast %40 : vector<8xf32> to vector<8x1xf32>
    %cst_16 = arith.constant 1.000000e+00 : f32
    %42 = vector.broadcast %cst_16 : f32 to vector<8x1xf32>
    %43 = arith.addf %41, %42 : vector<8x1xf32>
    %cst_17 = arith.constant 5.000000e-01 : f32
    %44 = vector.broadcast %cst_17 : f32 to vector<8x1xf32>
    %45 = arith.mulf %44, %43 : vector<8x1xf32>
    %46 = arith.subf %45, %9 : vector<8x1xf32>
    %47 = arith.mulf %46, %2 : vector<8x1xf32>
    %c0_18 = arith.constant 0 : index
    %c0_19 = arith.constant 0 : index
    %48 = vector.load %arg4[%c0_18, %c0_19] : memref<8x1xf32, #tpu.memory_space<vmem>>, vector<8x1xf32>
    tpu.vector_store %arg4[%c0_18, %c0_19], %47 {strides = array<i32>} : memref<8x1xf32, #tpu.memory_space<vmem>>, vector<8x1xf32>,
    return
  }
  func.func @transform_0(%arg0: i32) -> (i32, i32) {
    %c0_i32 = arith.constant 0 : i32
    %c0_i32_0 = arith.constant 0 : i32
    return %arg0, %c0_i32 : i32, i32
  }
  func.func @transform_1(%arg0: i32) -> (i32, i32) {
    %c0_i32 = arith.constant 0 : i32
    %c0_i32_0 = arith.constant 0 : i32
    return %arg0, %c0_i32 : i32, i32
  }
  func.func @transform_2(%arg0: i32) -> (i32, i32) {
    %c0_i32 = arith.constant 0 : i32
    %c0_i32_0 = arith.constant 0 : i32
    return %arg0, %c0_i32 : i32, i32
  }
  func.func @transform_3(%arg0: i32) -> (i32, i32) {
    %c0_i32 = arith.constant 0 : i32
    %c0_i32_0 = arith.constant 0 : i32
    return %arg0, %c0_i32 : i32, i32
  }
}

</mosaic_0001>

<bundles_post_ra>
// kernel: single_label_sparsemax.1
= control target key start
LH: loop header
LB: loop body
LE: loop exit
PB: predicated region body
PF: predicated region fallthrough
CT: control target
= control target key end

     0   :  { %v163_v0 = vmov 0   ;;  %vm24_vm0 = vcmask 261120   ;;  %v17_v4 = vlaneseq  ;;  %v151_v13 = vmov 0.0   ;;  %s209_s1 = inlined_call_operand.vmem [shape: s32[8,1], index: 1, kind: input, shape index: {}]   ;;  %s210_s0 = inlined_call_operand.vmem [shape: f32[8,32], index: 0, kind: input, shape index: {}]   ;;  %s211_s3 = inlined_call_operand.vmem [shape: f32[8,1], index: 3, kind: output, shape index: {}]   ;;  %s212_s2 = inlined_call_operand.vmem [shape: f32[8,1], index: 2, kind: input, shape index: {}]  }
   0x1   :  { %136 = vset.pattern.permute.xlu0 %v163_v0  ;;  %v15_v1 = vld [vmem:[%s209_s1] sm:$0xff]  ;;  %v155_v14 = vmov -1.0  }
   0x2   :  { %20 = vperm.xlu0 %136, %v15_v1   ;;  %v14_v2 = vld [vmem:[%s210_s0] sm:$0xff]  ;;  %v18_v5 = vand.u32 127, %v17_v4  ;;  %s159_s0 = smov 0  }
   0x3   :  { %v28_v3 = vsel %vm24_vm0, %v14_v2, -inf  ;;  %v196_v11 = vld [vmem:[%s212_s2] sm:$0xff] }
  0x2c   :  { %29 = vmax.xlane.f32.xlu0 %v28_v3 }
  0x74   :  { %v21_v6 = vpop.permute.xlu0 %20 }
  0x75   :  { %vm22_vm1 = vcmp.eq.s32.totalorder %v18_v5, %v21_v6 }
  0x76   :  { %v23_v7 = vsel %vm22_vm1, %v14_v2, 0.0 }
  0x77   :  { %v25_v8 = vsel %vm24_vm0, %v23_v7, 0.0 }
  0x78   :  { %26 = vadd.xlane.f32.xlu1 %v25_v8 }
  0x9f   :  { %v30_v9 = vpop.xlane.xlu0 %29 }
  0xa0   :  { %v31_v10 = vsub.f32 %v14_v2, %v30_v9 }
  0xeb   :  { %v198_v12 = vpop.xlane.xlu1 %26 }
  0xec LB: > { %v40_v15 = vadd.f32 %v153_v13, %v157_v14  ;;  %s37_s0 = sadd.s32 1, %s161_s0   ;;  %s161_s0 = sphi %s159_s0, %s37_s0   ;;  %v157_v14 = vphi %v155_v14, %v156_v14   ;;  %v153_v13 = vphi %v151_v13, %v152_v13  }
  0xed   : > { %p34_p0 = scmp.ge.s32.totalorder %s37_s0, 30  }
  0xee   : > { %v41_v16 = vmul.f32 0.5, %v40_v15  ;;  %v164_v26 = vmov (%p34_p0), 0.0   ;;  %v79_v45 = vmul.f32 (%p34_p0), %v31_v10, %v31_v10  ;;  %vm90_vm8 = vcmask (%p34_p0), 7168  }
  0xf0   : > { %v42_v17 = vsub.f32 %v31_v10, %v41_v16 }
  0xf2   : > { %v43_v18 = vmax.f32 %v42_v17, 0.0 }
  0xf4   : > { %v44_v19 = vsel %vm24_vm0, %v43_v18, 0.0 }
  0xf5   : > { %45 = vadd.xlane.f32.xlu0 %v44_v19 }
 0x168   : > { %v46_v20 = vpop.xlane.xlu0 %45 }
 0x169   : > { %v107_v21 = vadd.f32 -1.0, %v46_v20  ;;  %36 = sbr.rel (!%p34_p0) target bundleno = 236 (0xec), region = 39 }
 0x16b   : > { %vm48_vm2 = vcmp.gt.f32.partialorder %v107_v21, 0.0 }
 0x16c   : > { %v49_v22 = vsel %vm48_vm2, %v41_v16, %v157_v14   ;;  %v50_v23 = vsel %vm48_vm2, %v153_v13, %v41_v16  }
 0x16d   : > { %v152_v13 = vmov %v50_v23   ;;  %v156_v14 = vmov %v49_v22   ;;  %v51_v24 = vadd.f32 (%p34_p0), %v50_v23, %v49_v22 }
 0x16f   :  { %v52_v25 = vmul.f32 0.5, %v51_v24 }
 0x171   :  { %vm53_vm3 = vcmp.gt.f32.partialorder %v31_v10, %v52_v25 }
 0x172   :  { %v108_v27 = vsel %vm53_vm3, 1.0, %v164_v26  ;;  %v59_v29 = vsel %vm53_vm3, %v31_v10, 0.0 }
 0x173   :  { %v56_v28 = vsel %vm24_vm0, %v108_v27, 0.0  ;;  %v60_v30 = vsel %vm24_vm0, %v59_v29, 0.0 }
 0x174   :  { %57 = vadd.xlane.f32.xlu0 %v56_v28 }
 0x17c   :  { %61 = vadd.xlane.f32.xlu0 %v60_v30 }
 0x1e7   :  { %v58_v31 = vpop.xlane.xlu0 %57 }
 0x1e8   :  { %137 = vrcp.f32 %v58_v31  ;;  %v75_v35 = vand.u32 2147483648, %v58_v31  ;;  %v73_v38 = vand.u32 2147483647, %v58_v31  ;;  %vm69_vm5 = vweird.f32 %v58_v31 }
 0x1ea   :  { %v76_v41 = vor.u32 1.1754944e-38, %v75_v35  ;;  %vm74_vm7 = vcmp.eq.f32.partialorder %v73_v38, 8.507059e+37 }
 0x1ee   :  { %v138_v32 = vpop.eup %137 }
 0x1ef   :  { %v65_v33 = vmul.f32 %v138_v32, %v58_v31  ;;  %v62_v36 = vpop.xlane.xlu0 %61  ;;  %vm70_vm4 = vweird.f32 %v138_v32 }
 0x1f0   :  { %v109_v40 = vadd.f32 -1.0, %v62_v36  ;;  %vm71_vm6 = vmor %vm69_vm5, %vm70_vm4 }
 0x1f1   :  { %v66_v34 = vsub.f32 1.0, %v65_v33 }
 0x1f3   :  { %v67_v37 = vmul.f32 %v138_v32, %v66_v34 }
 0x1f5   :  { %v68_v39 = vadd.f32 %v138_v32, %v67_v37 }
 0x1f7   :  { %v72_v42 = vsel %vm71_vm6, %v138_v32, %v68_v39 }
 0x1f8   :  { %v77_v43 = vsel %vm74_vm7, %v76_v41, %v72_v42 }
 0x1f9   :  { %v78_v44 = vmul.f32 %v109_v40, %v77_v43 }
 0x1fb   :  { %v80_v46 = vmul.f32 %v78_v44, %v78_v44 }
 0x1fd   :  { %v81_v47 = vsub.f32 %v79_v45, %v80_v46 }
 0x1ff   :  { %v82_v48 = vmax.f32 %v81_v47, 0.0 }
 0x201   :  { %v83_v49 = vsel %vm24_vm0, %v82_v48, 0.0 }
 0x202   :  { %84 = vadd.xlane.f32.xlu1 %v83_v49 }
 0x275   :  { %v85_v50 = vpop.xlane.xlu1 %84 }
 0x276   :  { %v86_v51 = vadd.f32 1.0, %v85_v50 }
 0x278   :  { %v87_v52 = vmul.f32 0.5, %v86_v51 }
 0x27a   :  { %v88_v53 = vsub.f32 %v87_v52, %v198_v12 }
 0x27c   :  { %v89_v54 = vmul.f32 %v88_v53, %v196_v11 }
 0x27e   :  { %91 = vst.msk [vmem:[%s211_s3] sm:$0xff] %vm90_vm8, %v89_v54 }

</bundles_post_ra>
